<compile_context>
chip_gen: v6e
topology: v6e:2x2x1
jax: 0.10.0
libtpu: 0.0.40
codegen_flags: <defaults>
</compile_context>

<pallas_src>
import jax
import jax.numpy as jnp
from jax.experimental import pallas as pl
from jax.experimental.pallas import tpu as pltpu

_LANE = 128                 # lanes per vreg (last dim)
_TILE_BYTES = 1 << 20       # ~1 MiB per input tile


def _bias_add_kernel(x_ref, b_ref, o_ref):
    # b_ref is either (1, TC)  -> row bias, broadcast over sublanes (2D path)
    #             or (TR, 1)   -> per-row bias, broadcast over lanes (4D path)
    # jnp broadcasting handles both; everything stays on the VPU.
    o_ref[...] = x_ref[...] + b_ref[...]


def _sublane_align(dtype):
    """Sublane multiple for a packed dtype (8 for f32, 16 for bf16, 32 for i8)."""
    return max(8, 32 // jnp.dtype(dtype).itemsize)


def _pick_col_tile(cols):
    """Largest multiple of 128 <= min(cols, 2048); full extent if cols < 128."""
    if cols <= _LANE:
        return cols  # full-extent last dim is always legal
    t = min(cols, 2048)
    t -= t % _LANE
    return max(t, _LANE)


def _pick_row_tile(rows, t_c, itemsize, align):
    """Row tile sized so t_r * t_c * itemsize <= ~1 MiB, aligned to sublanes."""
    if rows <= align:
        return rows  # full-extent second-to-last dim is always legal
    cap = max(align, _TILE_BYTES // max(1, t_c * itemsize))
    t = min(rows, cap)
    t -= t % align
    return max(t, align)


def _pallas_bias_add(x2d, b2d):
    """out[r, c] = x2d[r, c] + b2d  (b2d is (R,1) or (1,C) and broadcasts)."""
    R, C = x2d.shape
    b_rows, b_cols = b2d.shape
    itemsize = jnp.dtype(x2d.dtype).itemsize
    align = _sublane_align(x2d.dtype)

    t_c = _pick_col_tile(C)
    t_r = _pick_row_tile(R, t_c, itemsize, align)
    grid = (pl.cdiv(R, t_r), pl.cdiv(C, t_c))

    b_block = (t_r if b_rows != 1 else 1, t_c if b_cols != 1 else 1)
    b_index = lambda i, j: (i if b_rows != 1 else 0, j if b_cols != 1 else 0)

    return pl.pallas_call(
        _bias_add_kernel,
        out_shape=jax.ShapeDtypeStruct(x2d.shape, x2d.dtype),
        grid=grid,
        in_specs=[
            pl.BlockSpec((t_r, t_c), lambda i, j: (i, j)),
            pl.BlockSpec(b_block, b_index),
        ],
        out_specs=pl.BlockSpec((t_r, t_c), lambda i, j: (i, j)),
        compiler_params=pltpu.CompilerParams(
            dimension_semantics=("parallel", "parallel")),
    )(x2d, b2d)


def _add_bias_2d(x, bias):
    """x: (B, C); bias: (C,) broadcast over rows."""
    B, C = x.shape
    total = B * C
    if (_LANE % C == 0) and (total % _LANE == 0):
        # Lane-dense flatten: view x as (rows, colw) with colw a multiple of
        # 128 and tile the bias into one colw-wide row, so all 128 lanes of
        # every load/store are live instead of only C of them.
        colw = next(w for w in (2048, 1024, 512, 256, _LANE) if total % w == 0)
        rows = total // colw
        x_flat = x.reshape(rows, colw)
        b_row = jnp.tile(bias, colw // C).reshape(1, colw)
        out = _pallas_bias_add(x_flat, b_row)
        return out.reshape(B, C)
    # Fallback: tile over rows (and over C when C itself is lane-dense).
    return _pallas_bias_add(x, bias.reshape(1, C))


def _add_bias_4d(x, bias):
    """x: (N, C, H, W) NCHW; bias: (C,) added per channel."""
    N, C, H, W = x.shape
    HW = H * W
    R = N * C
    # Lane-dense view: rows are (n, c) planes of length H*W; the per-row bias
    # column broadcasts over the lane-mapped spatial axis inside the kernel.
    x2 = x.reshape(R, HW)
    b_col = jnp.tile(bias, N).reshape(R, 1)       # tiny (N*C,) materialization
    out = _pallas_bias_add(x2, b_col)
    return out.reshape(N, C, H, W)


class AddBias:
    """JAX/Pallas port of the PyTorch AddBias module."""

    def __init__(self, bias):
        # mirrors nn.Parameter(bias.unsqueeze(1)) -> stored as (C, 1)
        self._bias = jnp.asarray(bias).reshape(-1, 1)

    def __call__(self, x):
        C = self._bias.shape[0]
        bias = self._bias.reshape(-1).astype(x.dtype)   # match x dtype up front
        if x.ndim == 2:
            assert x.shape[1] == C
            return _add_bias_2d(x, bias)
        else:
            assert x.ndim == 4 and x.shape[1] == C
            return _add_bias_4d(x, bias)


if __name__ == "__main__":
    key = jax.random.PRNGKey(0)
    k_bias, k_x4, k_x4b, k_x2a, k_x2b = jax.random.split(key, 5)

    C = 4
    bias = jax.random.normal(k_bias, (C,), dtype=jnp.float32)
    mod = AddBias(bias)

    # 4D path: NCHW, batch=2, channels=4, spatial=16x16 (lane-dense H*W=256)
    x4 = jax.random.normal(k_x4, (2, C, 16, 16), dtype=jnp.float32)
    ref4 = x4 + bias.reshape(1, C, 1, 1)
    y4 = jax.block_until_ready(mod(x4))
    assert y4.shape == x4.shape and y4.dtype == x4.dtype
    assert jnp.allclose(y4, ref4, atol=1e-6), "4D AddBias mismatch"

    # 4D path, non-lane-dense spatial (H*W=25 < 128 -> full-extent last block)
    x4b = jax.random.normal(k_x4b, (2, C, 5, 5), dtype=jnp.float32)
    ref4b = x4b + bias.reshape(1, C, 1, 1)
    y4b = jax.block_until_ready(mod(x4b))
    assert y4b.shape == x4b.shape and y4b.dtype == x4b.dtype
    assert jnp.allclose(y4b, ref4b, atol=1e-6), "4D AddBias (small spatial) mismatch"

    # 2D path, small shape (fallback tiling): (batch=8, features=4)
    x2a = jax.random.normal(k_x2a, (8, C), dtype=jnp.float32)
    ref2a = x2a + bias.reshape(1, C)
    y2a = jax.block_until_ready(mod(x2a))
    assert y2a.shape == x2a.shape and y2a.dtype == x2a.dtype
    assert jnp.allclose(y2a, ref2a, atol=1e-6), "2D AddBias (fallback) mismatch"

    # 2D path, lane-dense flatten: (batch=64, features=4) -> 256-wide rows
    x2b = jax.random.normal(k_x2b, (64, C), dtype=jnp.float32)
    ref2b = x2b + bias.reshape(1, C)
    y2b = jax.block_until_ready(mod(x2b))
    assert y2b.shape == x2b.shape and y2b.dtype == x2b.dtype
    assert jnp.allclose(y2b, ref2b, atol=1e-6), "2D AddBias (lane-dense) mismatch"

    print("KERNEL_OK")
</pallas_src>

<mosaic_0001>
module attributes {stable_mosaic.version = 11 : i64} {
  func.func @_bias_add_kernel(%arg0: i32, %arg1: i32, %arg2: memref<8x256xf32, #tpu.memory_space<vmem>>, %arg3: memref<8x1xf32, #tpu.memory_space<vmem>>, %arg4: memref<8x256xf32, #tpu.memory_space<vmem>>) attributes {dimension_semantics = [#tpu.dimension_semantics<parallel>, #tpu.dimension_semantics<parallel>], iteration_bounds = array<i64: 1, 1>, scalar_prefetch = 0 : i64, scratch_operands = 0 : i64, tpu.core_type = #tpu.core_type<tc>, window_params = [{transform_indices = @transform_0, window_bounds = array<i64: 8, 256>}, {transform_indices = @transform_1, window_bounds = array<i64: 8, 1>}, {transform_indices = @transform_2, window_bounds = array<i64: 8, 256>}]} {
    %c0 = arith.constant 0 : index
    %c0_0 = arith.constant 0 : index
    %0 = vector.load %arg2[%c0, %c0_0] : memref<8x256xf32, #tpu.memory_space<vmem>>, vector<8x256xf32>
    %c0_1 = arith.constant 0 : index
    %c0_2 = arith.constant 0 : index
    %1 = vector.load %arg3[%c0_1, %c0_2] : memref<8x1xf32, #tpu.memory_space<vmem>>, vector<8x1xf32>
    %2 = vector.broadcast %1 : vector<8x1xf32> to vector<8x256xf32>
    %3 = arith.addf %0, %2 : vector<8x256xf32>
    %c0_3 = arith.constant 0 : index
    %c0_4 = arith.constant 0 : index
    %4 = vector.load %arg4[%c0_3, %c0_4] : memref<8x256xf32, #tpu.memory_space<vmem>>, vector<8x256xf32>
    tpu.vector_store %arg4[%c0_3, %c0_4], %3 {strides = array<i32>} : memref<8x256xf32, #tpu.memory_space<vmem>>, vector<8x256xf32>,
    return
  }
  func.func @transform_0(%arg0: i32, %arg1: i32) -> (i32, i32) {
    %c0_i32 = arith.constant 0 : i32
    return %arg0, %arg1 : i32, i32
  }
  func.func @transform_1(%arg0: i32, %arg1: i32) -> (i32, i32) {
    %c0_i32 = arith.constant 0 : i32
    %c0_i32_0 = arith.constant 0 : i32
    return %arg0, %c0_i32 : i32, i32
  }
  func.func @transform_2(%arg0: i32, %arg1: i32) -> (i32, i32) {
    %c0_i32 = arith.constant 0 : i32
    return %arg0, %arg1 : i32, i32
  }
}

</mosaic_0001>

<bundles_post_ra>
// kernel: tpu_custom_call.1
= control target key start
LH: loop header
LB: loop body
LE: loop exit
PB: predicated region body
PF: predicated region fallthrough
CT: control target
= control target key end

     0   :  { %7 = vsyncpa [#allocation3], 0  ;;  %s126_s0 = inlined_call_operand.hbm [shape: f32[8,256], index: 0, kind: input, shape index: {}]   ;;  %s127_s1 = inlined_call_operand.vmem [shape: f32[8,1], index: 1, kind: input, shape index: {}]   ;;  %s128_s2 = inlined_call_operand.hbm [shape: f32[8,256], index: 2, kind: output, shape index: {}]  }
   0x1   :  { %8 = vsyncpa [#allocation4], 0  ;;  %s99_s9 = smov [#allocation2]  }
   0x2   :  { %s15_s10 = sshll.u32 %s99_s9, 4  ;;  %s16_s10 = int_to_ptr.vmem [resolvable:$true] %s15_s10 }
   0x3   :  { %s63_s11 = scalar_lea.vmem %s16_s10, 256  ;;  %p68_p1 = scmp.lt.s32.totalorder %s16_s10, %s16_s10 }
   0x4   :  { %p64_p0 = scmp.ne.s32.totalorder %s16_s10, %s63_s11  ;;  %p69_p2 = scmp.lt.s32.totalorder %s63_s11, %s63_s11 }
   0x6   :  { %p70_p3 = por %p69_p2, %p68_p1 }
   0x8   :  { %p71_p4 = pnand %p70_p3, %p64_p0 }
   0xa   :  { %74 = shalt.err (!%p71_p4)
}
   0xb   :  { %18 = dma.hbm_to_vmem [thread:$0]  %s126_s0, 256, %s16_s10, [#allocation3]  }
   0xc   :  { %95 = dma.done.wait [#allocation3], 256  }
   0xd   :  { %96 = vsyncadd [#allocation3], 4294967040  ;;  %v100_v0 = vmov 0   ;;  %v26_v1 = vld [vmem:[%s127_s1] sm:$0xff]  ;;  %v25_v3 = vld [vmem:[#allocation2 + $0x8] sm:$0xff]  ;;  %s101_s16 = smov [#allocation5]  }
   0xe   :  { %54 = vset.pattern.permute.xlu0 %v100_v0  ;;  %v24_v2 = vld [vmem:[#allocation2] sm:$0xff]  ;;  %s42_s17 = sshll.u32 %s101_s16, 4  ;;  %s43_s17 = int_to_ptr.vmem [resolvable:$true] %s42_s17 }
   0xf   :  { %29 = vperm.xlu0 %54, %v26_v1   ;;  %s75_s0 = scalar_lea.vmem %s43_s17, 256  ;;  %p80_p6 = scmp.lt.s32.totalorder %s43_s17, %s43_s17 }
  0x10   :  { %p76_p5 = scmp.ne.s32.totalorder %s43_s17, %s75_s0  ;;  %p81_p7 = scmp.lt.s32.totalorder %s75_s0, %s75_s0 }
  0x12   :  { %p82_p8 = por %p81_p7, %p80_p6 }
  0x14   :  { %p83_p9 = pnand %p82_p8, %p76_p5 }
  0x8a   :  { %v30_v4 = vpop.permute.xlu0 %29 }
  0x8b   :  { %v32_v5 = vadd.f32 %v30_v4, %v24_v2  ;;  %v33_v6 = vadd.f32 %v30_v4, %v25_v3 }
  0x8d   :  { %34 = vst [vmem:[#allocation5] sm:$0xff] %v32_v5  ;;  %35 = vst [vmem:[#allocation5 + $0x8] sm:$0xff] %v33_v6 }
  0x8e   :  { %86 = shalt.err (!%p83_p9)
}
  0x8f   :  { %45 = dma.vmem_to_hbm [thread:$0]  %s43_s17, 256, %s128_s2, [#allocation4]  }
  0x90   :  { %97 = dma.done.wait [#allocation4], 256  }
  0x91   :  { %98 = vsyncadd [#allocation4], 4294967040 }
  0x92   :  { %49 = vsyncpa [#allocation3], 1 }
  0x93   :  { %50 = vsyncpa [#allocation4], 1 }

</bundles_post_ra>
